<compile_context>
chip_gen: v5e
topology: v5e:2x2
jax: 0.10.0
libtpu: 0.0.40
codegen_flags: <defaults>
</compile_context>

<pallas_src>
import math
import jax
import jax.numpy as jnp
from jax.experimental import pallas as pl
from jax.experimental.pallas import tpu as pltpu


# ---------------------------------------------------------------------------
# Kernels
# ---------------------------------------------------------------------------

def _transform_bias_kernel(x_ref, w_ref, b_ref, o_ref):
    # Single Transform layer: (tb, L) @ (L, Np) + (1, Np).
    # x is cast to the MXU dtype (bf16 by default) in-kernel; f32 accumulate.
    x = x_ref[...].astype(w_ref.dtype)
    out = jnp.dot(x, w_ref[...], preferred_element_type=jnp.float32)
    o_ref[...] = (out + b_ref[...]).astype(o_ref.dtype)


def _transform_nobias_kernel(x_ref, w_ref, o_ref):
    x = x_ref[...].astype(w_ref.dtype)
    out = jnp.dot(x, w_ref[...], preferred_element_type=jnp.float32)
    o_ref[...] = out.astype(o_ref.dtype)


def _mlp_kernel(x_ref, w1_ref, b1_ref, w2_ref, b2_ref, o_ref):
    # Fused stack of two Transform layers with ReLU in between
    # (GarmentPcaLayer's MultiPerceptro([L, 128, 64])).
    x = x_ref[...].astype(w1_ref.dtype)
    h = jnp.dot(x, w1_ref[...], preferred_element_type=jnp.float32)
    h = jnp.maximum(h + b1_ref[...], 0.0)                    # f32 epilogue
    out = jnp.dot(h.astype(w2_ref.dtype), w2_ref[...],
                  preferred_element_type=jnp.float32)
    o_ref[...] = (out + b2_ref[...]).astype(o_ref.dtype)


# ---------------------------------------------------------------------------
# Wrapper helpers
# ---------------------------------------------------------------------------

def _round_up(n, m):
    return ((n + m - 1) // m) * m


def _choose_batch_tile(B, tb):
    # One tile as large as requested (multiple of 8). No forced splitting:
    # large batches naturally yield >=2 grid steps at tb=512, which the
    # 'parallel' axis shards across TensorCores on v7x; single-TC chips get
    # one big tile (best measured HBM-roofline fraction).
    return max(8, min(tb, _round_up(B, 8)))


def _pad_cols(a, cols):
    return a if a.shape[-1] == cols else jnp.pad(a, ((0, 0), (0, cols - a.shape[-1])))


# ---------------------------------------------------------------------------
# Public forward functions
# ---------------------------------------------------------------------------

def transform_forward(x, w, b=None, *, tb=512, use_bf16=True, out_dtype=None):
    """Forward of the original `Transform` module: out = x @ W (+ b)."""
    if x.ndim == 1:
        x = x[None, :]                      # matches `x.unsqueeze(0) if x.dim() == 1`
    B, L = x.shape
    Lw, N = w.shape
    assert Lw == L, (Lw, L)
    out_dtype = x.dtype if out_dtype is None else out_dtype

    # Lane-dense output: pad output columns (of the resident weight only) to a
    # multiple of 128 so stores are unmasked vst; the extra MXU columns are free.
    Np = _round_up(max(N, 128), 128)
    mxu_dtype = jnp.bfloat16 if use_bf16 else w.dtype
    wp = _pad_cols(w, Np).astype(mxu_dtype)

    tb_eff = _choose_batch_tile(B, tb)
    grid = (pl.cdiv(B, tb_eff),)

    x_spec = pl.BlockSpec((tb_eff, L), lambda i: (i, 0))      # x streamed, native dtype
    w_spec = pl.BlockSpec((L, Np), lambda i: (0, 0))          # W resident
    out_spec = pl.BlockSpec((tb_eff, Np), lambda i: (i, 0))

    if b is not None:
        bp = _pad_cols(jnp.asarray(b, jnp.float32).reshape(1, -1), Np)
        kernel = _transform_bias_kernel
        in_specs = [x_spec, w_spec, pl.BlockSpec((1, Np), lambda i: (0, 0))]
        args = (x, wp, bp)
    else:
        kernel = _transform_nobias_kernel
        in_specs = [x_spec, w_spec]
        args = (x, wp)

    out = pl.pallas_call(
        kernel,
        out_shape=jax.ShapeDtypeStruct((B, Np), out_dtype),
        grid_spec=pltpu.PrefetchScalarGridSpec(
            num_scalar_prefetch=0,
            grid=grid,
            in_specs=in_specs,
            out_specs=out_spec,
        ),
        compiler_params=pltpu.CompilerParams(dimension_semantics=("parallel",)),
    )(*args)
    return out[:, :N]


def garment_pca_forward(x, w1, b1, w2, b2, *, tb=512, use_bf16=True, out_dtype=None):
    """Fused forward of two stacked Transform layers with ReLU in between
    (GarmentPcaLayer / MultiPerceptro([L, 128, 64]))."""
    if x.ndim == 1:
        x = x[None, :]
    B, L = x.shape
    H1 = w1.shape[1]
    H2 = w2.shape[1]
    out_dtype = x.dtype if out_dtype is None else out_dtype

    # Lane-dense hidden / output widths (the extra zero columns of MXU work are
    # free -- the kernel is nowhere near compute-bound).
    H1p = _round_up(max(H1, 128), 128)
    H2p = _round_up(max(H2, 128), 128)
    mxu_dtype = jnp.bfloat16 if use_bf16 else w1.dtype
    w1p = _pad_cols(w1, H1p).astype(mxu_dtype)
    b1p = _pad_cols(jnp.asarray(b1, jnp.float32).reshape(1, -1), H1p)
    w2p = jnp.pad(w2, ((0, H1p - H1), (0, H2p - H2))).astype(mxu_dtype)
    b2p = _pad_cols(jnp.asarray(b2, jnp.float32).reshape(1, -1), H2p)

    tb_eff = _choose_batch_tile(B, tb)
    grid = (pl.cdiv(B, tb_eff),)

    out = pl.pallas_call(
        _mlp_kernel,
        out_shape=jax.ShapeDtypeStruct((B, H2p), out_dtype),
        grid_spec=pltpu.PrefetchScalarGridSpec(
            num_scalar_prefetch=0,
            grid=grid,
            in_specs=[
                pl.BlockSpec((tb_eff, L), lambda i: (i, 0)),   # x tile (native dtype)
                pl.BlockSpec((L, H1p), lambda i: (0, 0)),      # W1 (resident)
                pl.BlockSpec((1, H1p), lambda i: (0, 0)),      # b1
                pl.BlockSpec((H1p, H2p), lambda i: (0, 0)),    # W2 (resident)
                pl.BlockSpec((1, H2p), lambda i: (0, 0)),      # b2
            ],
            out_specs=pl.BlockSpec((tb_eff, H2p), lambda i: (i, 0)),
        ),
        compiler_params=pltpu.CompilerParams(dimension_semantics=("parallel",)),
    )(x, w1p, b1p, w2p, b2p)
    return out[:, :H2]


# ---------------------------------------------------------------------------
# Init + plain-JAX references
# ---------------------------------------------------------------------------

def init_garment_pca_params(key, latent_size, dims=None, dtype=jnp.float32):
    """Synthetic init matching the PyTorch module's shapes.

    Transform.weight is stored (in, out) and initialized with
    kaiming_uniform_(a=sqrt(5)); PyTorch's fan_in for an (in, out) tensor is
    size(1) = out, so bound = sqrt(6 / (6 * out)) = 1/sqrt(out).
    Transform.bias is (1, out), zero-init.
    """
    if dims is None:
        dims = [latent_size, 128, 64]
    params = []
    for ind in range(len(dims) - 1):
        din, dout = dims[ind], dims[ind + 1]
        key, sub = jax.random.split(key)
        fan_in = dout  # matches nn.init semantics on the (in, out)-stored tensor
        bound = math.sqrt(6.0 / ((1.0 + 5.0) * fan_in))
        w = jax.random.uniform(sub, (din, dout), dtype=dtype,
                               minval=-bound, maxval=bound)
        b = jnp.zeros((1, dout), dtype=dtype)
        params.append((w, b))
    return params


def reference_transform(x, w, b=None, use_bf16=True):
    if x.ndim == 1:
        x = x[None, :]
    dt = jnp.bfloat16 if use_bf16 else x.dtype
    out = jnp.dot(x.astype(dt), w.astype(dt), preferred_element_type=jnp.float32)
    if b is not None:
        out = out + b.astype(jnp.float32)
    return out.astype(x.dtype)


def reference_mlp(x, params, use_bf16=True):
    if x.ndim == 1:
        x = x[None, :]
    dt = jnp.bfloat16 if use_bf16 else x.dtype
    out_dtype = x.dtype
    h = x
    for ind, (w, b) in enumerate(params):
        h = jnp.dot(h.astype(dt), w.astype(dt),
                    preferred_element_type=jnp.float32) + b.astype(jnp.float32)
        if ind < len(params) - 1:
            h = jax.nn.relu(h)
    return h.astype(out_dtype)


# ---------------------------------------------------------------------------
# Demo / self-test
# ---------------------------------------------------------------------------

if __name__ == "__main__":
    key = jax.random.PRNGKey(0)

    latent_size = 32
    batch = 10  # deliberately NOT a multiple of 8 -> exercises the ragged cdiv grid

    pkey, xkey, bkey = jax.random.split(key, 3)
    (w1, b1), (w2, b2) = init_garment_pca_params(pkey, latent_size)
    x = jax.random.normal(xkey, (batch, latent_size), dtype=jnp.float32)
    b_rand = 0.1 * jax.random.normal(bkey, (1, w1.shape[1]), dtype=jnp.float32)

    # 1) Single Transform layer (the original module): out = x @ W + b.
    t_out = jax.block_until_ready(transform_forward(x, w1, b_rand))
    t_ref = reference_transform(x, w1, b_rand)
    assert t_out.shape == (batch, 128), t_out.shape
    assert jnp.allclose(t_out, t_ref, atol=1e-2, rtol=1e-2), "Transform mismatch"

    # 1b) bias=False path (dedicated bias-free kernel, no synthesized zeros).
    nb_out = jax.block_until_ready(transform_forward(x, w1, None))
    nb_ref = reference_transform(x, w1, None)
    assert jnp.allclose(nb_out, nb_ref, atol=1e-2, rtol=1e-2), "no-bias mismatch"

    # 1c) 1-D input path (matches `x.unsqueeze(0)` in PyTorch).
    t1 = jax.block_until_ready(transform_forward(x[0], w1, b_rand))
    assert t1.shape == (1, 128), t1.shape
    assert jnp.allclose(t1, reference_transform(x[0], w1, b_rand),
                        atol=1e-2, rtol=1e-2), "1-D Transform mismatch"

    # 1d) f32 MXU path (use_bf16=False) -- tighter tolerance.
    f32_out = jax.block_until_ready(transform_forward(x, w1, b_rand, use_bf16=False))
    f32_ref = reference_transform(x, w1, b_rand, use_bf16=False)
    assert jnp.allclose(f32_out, f32_ref, atol=1e-5, rtol=1e-5), "f32 Transform mismatch"

    # 2) Fused stack of Transform layers (GarmentPcaLayer decoder).
    out = jax.block_until_ready(garment_pca_forward(x, w1, b1, w2, b2))
    ref = reference_mlp(x, [(w1, b1), (w2, b2)])
    assert out.shape == (batch, 64), out.shape
    assert jnp.allclose(out, ref, atol=1e-2, rtol=1e-2), "fused MLP mismatch"

    print("KERNEL_OK")
</pallas_src>

<mosaic_0001>
module attributes {stable_mosaic.version = 11 : i64} {
  func.func @_transform_bias_kernel(%arg0: i32, %arg1: memref<16x32xf32, #tpu.memory_space<vmem>>, %arg2: memref<32x128xbf16, #tpu.memory_space<vmem>>, %arg3: memref<1x128xf32, #tpu.memory_space<vmem>>, %arg4: memref<16x128xf32, #tpu.memory_space<vmem>>) attributes {dimension_semantics = [#tpu.dimension_semantics<parallel>], iteration_bounds = array<i64: 1>, scalar_prefetch = 0 : i64, scratch_operands = 0 : i64, tpu.core_type = #tpu.core_type<tc>, window_params = [{transform_indices = @transform_0, window_bounds = array<i64: 16, 32>}, {pipeline_mode = #tpu.pipeline_mode<synchronous>, transform_indices = @transform_1, window_bounds = array<i64: 32, 128>}, {pipeline_mode = #tpu.pipeline_mode<synchronous>, transform_indices = @transform_2, window_bounds = array<i64: 1, 128>}, {transform_indices = @transform_3, window_bounds = array<i64: 16, 128>}]} {
    %c0 = arith.constant 0 : index
    %c0_0 = arith.constant 0 : index
    %0 = vector.load %arg1[%c0, %c0_0] : memref<16x32xf32, #tpu.memory_space<vmem>>, vector<16x32xf32>
    %1 = arith.truncf %0 : vector<16x32xf32> to vector<16x32xbf16>
    %c0_1 = arith.constant 0 : index
    %c0_2 = arith.constant 0 : index
    %2 = vector.load %arg2[%c0_1, %c0_2] : memref<32x128xbf16, #tpu.memory_space<vmem>>, vector<32x128xbf16>
    %cst = arith.constant dense<0.000000e+00> : vector<16x128xf32>
    %3 = tpu.matmul %1, %2, %cst {dimension_numbers = #tpu.dot_dimension_numbers<[1], [0], [0], [1], [0, 0, 1, 1], [], []>} : vector<16x32xbf16>, vector<32x128xbf16>, vector<16x128xf32> -> vector<16x128xf32>
    %c0_3 = arith.constant 0 : index
    %c0_4 = arith.constant 0 : index
    %4 = vector.load %arg3[%c0_3, %c0_4] : memref<1x128xf32, #tpu.memory_space<vmem>>, vector<1x128xf32>
    %5 = vector.broadcast %4 : vector<1x128xf32> to vector<16x128xf32>
    %6 = arith.addf %3, %5 : vector<16x128xf32>
    %c0_5 = arith.constant 0 : index
    %c0_6 = arith.constant 0 : index
    %7 = vector.load %arg4[%c0_5, %c0_6] : memref<16x128xf32, #tpu.memory_space<vmem>>, vector<16x128xf32>
    tpu.vector_store %arg4[%c0_5, %c0_6], %6 {strides = array<i32>} : memref<16x128xf32, #tpu.memory_space<vmem>>, vector<16x128xf32>,
    return
  }
  func.func @transform_0(%arg0: i32) -> (i32, i32) {
    %c0_i32 = arith.constant 0 : i32
    %c0_i32_0 = arith.constant 0 : i32
    return %arg0, %c0_i32 : i32, i32
  }
  func.func @transform_1(%arg0: i32) -> (i32, i32) {
    %c0_i32 = arith.constant 0 : i32
    %c0_i32_0 = arith.constant 0 : i32
    %c0_i32_1 = arith.constant 0 : i32
    return %c0_i32, %c0_i32_0 : i32, i32
  }
  func.func @transform_2(%arg0: i32) -> (i32, i32) {
    %c0_i32 = arith.constant 0 : i32
    %c0_i32_0 = arith.constant 0 : i32
    %c0_i32_1 = arith.constant 0 : i32
    return %c0_i32, %c0_i32_0 : i32, i32
  }
  func.func @transform_3(%arg0: i32) -> (i32, i32) {
    %c0_i32 = arith.constant 0 : i32
    %c0_i32_0 = arith.constant 0 : i32
    return %arg0, %c0_i32 : i32, i32
  }
}

</mosaic_0001>

<bundles_post_ra>
// kernel: tpu_custom_call.1
= control target key start
LH: loop header
LB: loop body
LE: loop exit
PB: predicated region body
PF: predicated region fallthrough
CT: control target
= control target key end

     0   :  { %8 = vsyncpa [#allocation3], 0  ;;  %s253_s0 = inlined_call_operand.hbm [shape: f32[10,32], index: 0, kind: input, shape index: {}]   ;;  %s254_s1 = inlined_call_operand.hbm [shape: bf16[32,128], index: 1, kind: input, shape index: {}]   ;;  %s255_s2 = inlined_call_operand.vmem [shape: f32[1,128], index: 2, kind: input, shape index: {}]   ;;  %s256_s3 = inlined_call_operand.hbm [shape: f32[10,128], index: 3, kind: output, shape index: {}]  }
   0x1   :  { %9 = vsyncpa [#allocation6], 0 }
   0x2   :  { %10 = vsyncpa [#allocation4], 0  ;;  %s15_s14 = sshll.u32 %s253_s0, 4  ;;  %s208_s15 = smov [#allocation2]   ;;  %s16_s14 = int_to_ptr.hbm [resolvable:$true] %s15_s14 }
   0x3   :  { %s17_s16 = sshll.u32 %s208_s15, 4  ;;  %s28_s19 = sshll.u32 %s254_s1, 4  ;;  %s18_s16 = int_to_ptr.vmem [resolvable:$true] %s17_s16  ;;  %s29_s19 = int_to_ptr.hbm [resolvable:$true] %s28_s19 }
   0x4   :  { %s209_s20 = smov 128   ;;  %s210_s21 = smov 8  }
   0x5   :  { %23 = dma.hbm_to_vmem [thread:$0]  %s16_s14, 256, %s18_s16, [#allocation3], %s209_s20, %s209_s20, %s210_s21  }
   0x6   :  { %s211_s22 = smov [#allocation5]   ;;  %s212_s24 = smov 64  }
   0x7   :  { %s30_s23 = sshll.u32 %s211_s22, 4  ;;  %s213_s0 = smov 4   ;;  %s31_s23 = int_to_ptr.vmem [resolvable:$true] %s30_s23 }
   0x8   :  { %36 = dma.hbm_to_vmem [thread:$0]  %s29_s19, 256, %s31_s23, [#allocation6], %s212_s24, %s212_s24, %s213_s0  }
   0x9   :  { %202 = dma.done.wait [#allocation3], 256  }
   0xa   :  { %203 = vsyncadd [#allocation3], 4294967040 }
   0xb   :  { %204 = dma.done.wait [#allocation6], 256  }
   0xc   :  { %205 = vsyncadd [#allocation6], 4294967040  ;;  %v121_v0 = vld [vmem:[#allocation5 + $0x8] sm:$0xff]  ;;  %v120_v1 = vld [vmem:[#allocation5] sm:$0xff]  ;;  %vm71_vm0 = vcmask 261120   ;;  %s214_s26 = smov [#allocation7]  }
   0xd   :  { %81 = vmatpush.bf16.msra.mxu0 %v121_v0  ;;  %v48_v2 = vld [vmem:[#allocation2] sm:$0xff]  ;;  %v49_v3 = vld [vmem:[#allocation2 + $0x8] sm:$0xff]  ;;  %s95_s27 = sshll.u32 %s214_s26, 4  ;;  %s97_s30 = sshll.u32 %s256_s3, 4  ;;  %s96_s27 = int_to_ptr.vmem [resolvable:$true] %s95_s27  ;;  %s98_s30 = int_to_ptr.hbm [resolvable:$true] %s97_s30 }
   0xe   :  { %v50_v4 = vpack.c.bf16 %v49_v3, %v48_v2  ;;  %v129_v5 = vld [vmem:[%s255_s2] ss:$0 sm:$0xff] }
  0x11   :  { %82 = vmatpush.bf16.msra.mxu0 %v120_v1 }
  0x14   :  { %119 = vmatmul.msk.bf16.vlgmr.msra.gmra.mxu0 %vm71_vm0, %v50_v4 }
  0x91   :  { %v84_v6 = vpop.f32.mrf.mxu0 }
  0x92   :  { %v85_v7 = vadd.f32 %v129_v5, %v84_v6 }
  0x94   :  { %89 = vst [vmem:[#allocation7] sm:$0xff] %v85_v7 }
  0x99   :  { %v86_v8 = vpop.f32.mrf.mxu0 }
  0x9a   :  { %v87_v9 = vadd.f32 %v129_v5, %v86_v8 }
  0x9c   :  { %90 = vst [vmem:[#allocation7 + $0x8] sm:$0xff] %v87_v9 }
  0x9d   :  { %103 = dma.vmem_to_hbm [thread:$0]  %s96_s27, 256, %s98_s30, [#allocation4], %s209_s20, %s209_s20, %s210_s21  }
  0x9e   :  { %206 = dma.done.wait [#allocation4], 256  }
  0x9f   :  { %207 = vsyncadd [#allocation4], 4294967040 }
  0xa0   :  { %108 = vsyncpa [#allocation3], 1 }
  0xa1   :  { %109 = vsyncpa [#allocation6], 1 }
  0xa2   :  { %110 = vsyncpa [#allocation4], 1 }

</bundles_post_ra>
